<compile_context>
chip_gen: v6e
topology: v6e:2x2x1
jax: 0.10.0
libtpu: 0.0.40
codegen_flags: <defaults>
</compile_context>

<pallas_src>
import math

import jax
import jax.numpy as jnp
from jax.experimental import pallas as pl
from jax.experimental.pallas import tpu as pltpu


def _pfa_kernel(x_ref, w_ref, b_ref, o_ref):
    # x_ref: (TM, D)  w_ref: (D, D) [= W^T]  b_ref: (1, D)  o_ref: (TM, D)
    y = jnp.dot(x_ref[...], w_ref[...], preferred_element_type=jnp.float32)
    o_ref[...] = (y + b_ref[...]).astype(o_ref.dtype)


def _round_up(x, mult):
    return ((x + mult - 1) // mult) * mult


def pfa_forward(feature, weight, bias, *, tm=512):
    """feature: (..., D); weight: (D, D) [nn.Linear layout, (out, in)]; bias: (D,)."""
    orig_shape = feature.shape
    d = orig_shape[-1]
    x = feature.reshape(-1, d)
    m = x.shape[0]

    # ---- choose the row tile TM (8-aligned, VMEM-safe on all generations) ----
    # Per-buffer budget ~4 MiB => double-buffered in+out tiles ~16 MiB worst
    # case still fits the 16 MiB v5e scoped default together with the weight
    # for any reasonable D (the demo D is tiny anyway).
    bytes_per_row = 4 * d
    tm_cap = max(8, (4 * 1024 * 1024 // bytes_per_row) // 8 * 8)
    m_aligned = _round_up(m, 8)
    tm = min(tm, tm_cap, m_aligned)
    tm = max(8, _round_up(tm, 8))

    m_pad = _round_up(m, tm)
    if m_pad != m:
        x = jnp.pad(x, ((0, m_pad - m), (0, 0)))

    w_t = weight.T.astype(feature.dtype)       # (D_in, D_out) so kernel does x @ W^T
    b2 = bias.reshape(1, d).astype(feature.dtype)

    grid = (m_pad // tm,)

    out = pl.pallas_call(
        _pfa_kernel,
        out_shape=jax.ShapeDtypeStruct((m_pad, d), feature.dtype),
        grid_spec=pl.GridSpec(
            grid=grid,
            in_specs=[
                pl.BlockSpec((tm, d), lambda i: (i, 0)),   # streamed row tiles
                pl.BlockSpec((d, d), lambda i: (0, 0)),    # weight: resident
                pl.BlockSpec((1, d), lambda i: (0, 0)),    # bias:   resident
            ],
            out_specs=pl.BlockSpec((tm, d), lambda i: (i, 0)),
        ),
        compiler_params=pltpu.CompilerParams(
            dimension_semantics=("parallel",),
        ),
        cost_estimate=pl.CostEstimate(
            flops=2 * m_pad * d * d,
            transcendentals=0,
            bytes_accessed=4 * (2 * m_pad * d + d * d + d),
        ),
    )(x, w_t, b2)

    if m_pad != m:
        out = out[:m]
    return out.reshape(*orig_shape[:-1], d)


def init_pfa_params(key, input_dim, dtype=jnp.float32):
    """Mirror nn.Linear(D, D) default init: uniform(-1/sqrt(D), 1/sqrt(D))."""
    kw, kb = jax.random.split(key)
    bound = 1.0 / math.sqrt(input_dim)
    weight = jax.random.uniform(kw, (input_dim, input_dim), dtype, -bound, bound)
    bias = jax.random.uniform(kb, (input_dim,), dtype, -bound, bound)
    return weight, bias


if __name__ == "__main__":
    key = jax.random.PRNGKey(0)
    k_feat, k_param = jax.random.split(key)

    batch, seq, input_dim = 2, 8, 32
    feature = jax.random.normal(k_feat, (batch, seq, input_dim), jnp.float32)
    weight, bias = init_pfa_params(k_param, input_dim)

    adapted = pfa_forward(feature, weight, bias)
    jax.block_until_ready(adapted)

    # Pure-JAX reference check.
    ref = feature @ weight.T + bias
    assert adapted.shape == (batch, seq, input_dim), adapted.shape
    assert jnp.allclose(adapted, ref, atol=1e-5), float(jnp.max(jnp.abs(adapted - ref)))

    print("KERNEL_OK")
</pallas_src>

<mosaic_0001>
module attributes {stable_mosaic.version = 11 : i64} {
  func.func @_pfa_kernel(%arg0: i32, %arg1: memref<16x32xf32, #tpu.memory_space<vmem>>, %arg2: memref<32x32xf32, #tpu.memory_space<vmem>>, %arg3: memref<1x32xf32, #tpu.memory_space<vmem>>, %arg4: memref<16x32xf32, #tpu.memory_space<vmem>>) attributes {dimension_semantics = [#tpu.dimension_semantics<parallel>], iteration_bounds = array<i64: 1>, scalar_prefetch = 0 : i64, scratch_operands = 0 : i64, tpu.core_type = #tpu.core_type<tc>, window_params = [{transform_indices = @transform_0, window_bounds = array<i64: 16, 32>}, {pipeline_mode = #tpu.pipeline_mode<synchronous>, transform_indices = @transform_1, window_bounds = array<i64: 32, 32>}, {pipeline_mode = #tpu.pipeline_mode<synchronous>, transform_indices = @transform_2, window_bounds = array<i64: 1, 32>}, {transform_indices = @transform_3, window_bounds = array<i64: 16, 32>}]} {
    %c0 = arith.constant 0 : index
    %c0_0 = arith.constant 0 : index
    %0 = vector.load %arg1[%c0, %c0_0] : memref<16x32xf32, #tpu.memory_space<vmem>>, vector<16x32xf32>
    %c0_1 = arith.constant 0 : index
    %c0_2 = arith.constant 0 : index
    %1 = vector.load %arg2[%c0_1, %c0_2] : memref<32x32xf32, #tpu.memory_space<vmem>>, vector<32x32xf32>
    %cst = arith.constant dense<0.000000e+00> : vector<16x32xf32>
    %2 = tpu.matmul %0, %1, %cst {dimension_numbers = #tpu.dot_dimension_numbers<[1], [0], [0], [1], [0, 0, 1, 1], [], []>} : vector<16x32xf32>, vector<32x32xf32>, vector<16x32xf32> -> vector<16x32xf32>
    %c0_3 = arith.constant 0 : index
    %c0_4 = arith.constant 0 : index
    %3 = vector.load %arg3[%c0_3, %c0_4] : memref<1x32xf32, #tpu.memory_space<vmem>>, vector<1x32xf32>
    %4 = vector.broadcast %3 : vector<1x32xf32> to vector<16x32xf32>
    %5 = arith.addf %2, %4 : vector<16x32xf32>
    %c0_5 = arith.constant 0 : index
    %c0_6 = arith.constant 0 : index
    %6 = vector.load %arg4[%c0_5, %c0_6] : memref<16x32xf32, #tpu.memory_space<vmem>>, vector<16x32xf32>
    tpu.vector_store %arg4[%c0_5, %c0_6], %5 {strides = array<i32>} : memref<16x32xf32, #tpu.memory_space<vmem>>, vector<16x32xf32>,
    return
  }
  func.func @transform_0(%arg0: i32) -> (i32, i32) {
    %c0_i32 = arith.constant 0 : i32
    %c0_i32_0 = arith.constant 0 : i32
    return %arg0, %c0_i32 : i32, i32
  }
  func.func @transform_1(%arg0: i32) -> (i32, i32) {
    %c0_i32 = arith.constant 0 : i32
    %c0_i32_0 = arith.constant 0 : i32
    %c0_i32_1 = arith.constant 0 : i32
    return %c0_i32, %c0_i32_0 : i32, i32
  }
  func.func @transform_2(%arg0: i32) -> (i32, i32) {
    %c0_i32 = arith.constant 0 : i32
    %c0_i32_0 = arith.constant 0 : i32
    %c0_i32_1 = arith.constant 0 : i32
    return %c0_i32, %c0_i32_0 : i32, i32
  }
  func.func @transform_3(%arg0: i32) -> (i32, i32) {
    %c0_i32 = arith.constant 0 : i32
    %c0_i32_0 = arith.constant 0 : i32
    return %arg0, %c0_i32 : i32, i32
  }
}

</mosaic_0001>

<bundles_post_ra>
// kernel: tpu_custom_call.1
= control target key start
LH: loop header
LB: loop body
LE: loop exit
PB: predicated region body
PF: predicated region fallthrough
CT: control target
= control target key end

     0   :  { %8 = vsyncpa [#allocation3], 0  ;;  %s299_s0 = inlined_call_operand.hbm [shape: f32[16,32], index: 0, kind: input, shape index: {}]   ;;  %s300_s1 = inlined_call_operand.hbm [shape: f32[32,32], index: 1, kind: input, shape index: {}]   ;;  %s301_s2 = inlined_call_operand.vmem [shape: f32[1,32], index: 2, kind: input, shape index: {}]   ;;  %s302_s3 = inlined_call_operand.hbm [shape: f32[16,32], index: 3, kind: output, shape index: {}]  }
   0x1   :  { %9 = vsyncpa [#allocation6], 0 }
   0x2   :  { %10 = vsyncpa [#allocation4], 0  ;;  %s249_s12 = smov [#allocation2]  }
   0x3   :  { %s16_s13 = sshll.u32 %s249_s12, 4  ;;  %s17_s13 = int_to_ptr.vmem [resolvable:$true] %s16_s13 }
   0x4   :  { %s191_s14 = scalar_lea.vmem %s17_s13, 256  ;;  %p196_p1 = scmp.lt.s32.totalorder %s17_s13, %s17_s13 }
   0x5   :  { %p192_p0 = scmp.ne.s32.totalorder %s17_s13, %s191_s14  ;;  %p197_p2 = scmp.lt.s32.totalorder %s191_s14, %s191_s14 }
   0x7   :  { %p198_p3 = por %p197_p2, %p196_p1 }
   0x9   :  { %p199_p4 = pnand %p198_p3, %p192_p0 }
   0xb   :  { %202 = shalt.err (!%p199_p4)
}
   0xc   :  { %s250_s15 = smov 128   ;;  %s251_s16 = smov 8  }
   0xd   :  { %22 = dma.hbm_to_vmem [thread:$0]  %s299_s0, 256, %s17_s13, [#allocation3], %s250_s15, %s250_s15, %s251_s16  }
   0xe   :  { %s252_s19 = smov [#allocation5]  }
   0xf   :  { %s28_s20 = sshll.u32 %s252_s19, 4  ;;  %s29_s20 = int_to_ptr.vmem [resolvable:$true] %s28_s20 }
  0x10   :  { %s211_s21 = scalar_lea.vmem %s29_s20, 512  ;;  %p216_p6 = scmp.lt.s32.totalorder %s29_s20, %s29_s20 }
  0x11   :  { %p212_p5 = scmp.ne.s32.totalorder %s29_s20, %s211_s21  ;;  %p217_p7 = scmp.lt.s32.totalorder %s211_s21, %s211_s21 }
  0x13   :  { %p218_p8 = por %p217_p7, %p216_p6 }
  0x15   :  { %p219_p9 = pnand %p218_p8, %p212_p5 }
  0x17   :  { %222 = shalt.err (!%p219_p9)
}
  0x18   :  { %34 = dma.hbm_to_vmem [thread:$0]  %s300_s1, 512, %s29_s20, [#allocation6], %s250_s15, %s250_s15, %s251_s16  }
  0x19   :  { %243 = dma.done.wait [#allocation3], 256  }
  0x1a   :  { %244 = vsyncadd [#allocation3], 4294967040 }
  0x1b   :  { %245 = dma.done.wait [#allocation6], 512  }
  0x1c   :  { %246 = vsyncadd [#allocation6], 4294966784  ;;  %vm56_vm0 = vcmask 261120   ;;  %v48_v0 = vld [vmem:[#allocation5 + $0x18] sm:$0xff]  ;;  %v47_v1 = vld [vmem:[#allocation5 + $0x10] sm:$0xff]  ;;  %s253_s24 = smov [#allocation7]  }
  0x1d   :  { %167 = vmatprep.subr.mxu0 %v48_v0  ;;  %v43_v2 = vld [vmem:[#allocation2] sm:$0xff]  ;;  %v46_v3 = vld [vmem:[#allocation5 + $0x8] sm:$0xff]  ;;  %v45_v4 = vld [vmem:[#allocation5] sm:$0xff]  ;;  %s145_s25 = sshll.u32 %s253_s24, 4  ;;  %s146_s25 = int_to_ptr.vmem [resolvable:$true] %s145_s25 }
  0x1e   :  { %168 = vmatpush3.msra.mxu0 %v48_v0  ;;  %175 = vmatprep.mubr.msk.f32.mxu0 %vm56_vm0, %v43_v2  ;;  %v44_v5 = vld [vmem:[#allocation2 + $0x8] sm:$0xff]  ;;  %v158_v6 = vld [vmem:[%s301_s2] ss:$0 sm:$0xff]  ;;  %s223_s26 = scalar_lea.vmem %s146_s25, 256  ;;  %p228_p11 = scmp.lt.s32.totalorder %s146_s25, %s146_s25 }
  0x1f   :  { %169 = vmatprep.subr.mxu0 %v47_v1  ;;  %p224_p10 = scmp.ne.s32.totalorder %s146_s25, %s223_s26  ;;  %p229_p12 = scmp.lt.s32.totalorder %s223_s26, %s223_s26 }
  0x20   :  { %170 = vmatpush3.msra.mxu0 %v47_v1 }
  0x21   :  { %171 = vmatprep.subr.mxu0 %v46_v3  ;;  %p230_p13 = por %p229_p12, %p228_p11 }
  0x22   :  { %172 = vmatpush3.msra.mxu0 %v46_v3 }
  0x23   :  { %173 = vmatprep.subr.mxu0 %v45_v4  ;;  %p231_p0 = pnand %p230_p13, %p224_p10 }
  0x24   :  { %174 = vmatpush3.msra.mxu0 %v45_v4 }
  0x25   :  { %176 = vmatmul.mubr.msk.f32.vlgmr.msra.gmra.mxu0 %vm56_vm0, %v44_v5 }
  0xe5   :  { %v177_v7 = vpop.f32.mrf.mxu0 }
  0xe6   :  { %v135_v8 = vadd.f32 %v177_v7, %v158_v6 }
  0xe7   :  { %v129_v9 = vpop.f32.mrf.mxu0 }
  0xe8   :  { %139 = vst.msk [vmem:[#allocation7 + $0x8] sm:$0xff] %vm56_vm0, %v135_v8  ;;  %v130_v10 = vadd.f32 %v158_v6, %v129_v9 }
  0xea   :  { %138 = vst.msk [vmem:[#allocation7] sm:$0xff] %vm56_vm0, %v130_v10 }
  0xeb   :  { %234 = shalt.err (!%p231_p0)
}
  0xec   :  { %151 = dma.vmem_to_hbm [thread:$0]  %s146_s25, 256, %s302_s3, [#allocation4], %s250_s15, %s250_s15, %s251_s16  }
  0xed   :  { %247 = dma.done.wait [#allocation4], 256  }
  0xee   :  { %248 = vsyncadd [#allocation4], 4294967040 }
  0xef   :  { %155 = vsyncpa [#allocation3], 1 }
  0xf0   :  { %156 = vsyncpa [#allocation6], 1 }
  0xf1   :  { %157 = vsyncpa [#allocation4], 1 }

</bundles_post_ra>
